<compile_context>
chip_gen: v5e
topology: v5e:2x2
jax: 0.10.0
libtpu: 0.0.40
codegen_flags: <defaults>
</compile_context>

<pallas_src>
import jax
import jax.numpy as jnp
from jax import lax
from jax.experimental import pallas as pl
from jax.experimental.pallas import tpu as pltpu


CH_EMBED_DIM = 5
H_DIM = 10
VOCAB = 27
CTX = 3


def _round_up(x, m):
    return (x + m - 1) // m * m


def _neural_lm_kernel(idx_ref, w1t_ref, bias_ref, w2t_ref, out_ref):
    """Fused forward for one batch tile; batch sits on the lane axis.

    idx_ref  : (1, TM)   int32    packed char indices (i0 | i1<<5 | i2<<10)
    w1t_ref  : (10, 81)  bfloat16 folded (embedding @ weights) table, transposed
    bias_ref : (10, 1)   float32
    w2t_ref  : (27, 10)  bfloat16 s_weights transposed
    out_ref  : (27, TM)  float32  probabilities, transposed
    """
    tm = out_ref.shape[1]
    packed = idx_ref[...]                                             # (1, TM)

    # Unpack the three 5-bit character indices (constant-shift, lane-dense).
    i0 = packed & 31
    i1 = (packed >> 5) & 31
    i2 = (packed >> 10) & 31

    # One-hot^T over the flattened (3*27) context-vocab axis.  Row r in band c
    # (r in [27c, 27c+27)) is hot iff idx_c == r - 27c.  The three compares can
    # simply be OR'd: each can only fire inside its own band because the
    # unpacked indices are < 27.
    rows = lax.broadcasted_iota(jnp.int32, (CTX * VOCAB, tm), 0)      # (81, TM)
    hit = (rows == i0) | (rows - VOCAB == i1) | (rows - 2 * VOCAB == i2)
    onehot_t = hit.astype(jnp.bfloat16)                               # (81, TM), 0/1 exact

    # Stage 1: hidden^T = W1^T @ onehot^T  — single merged 81-wide contraction.
    acc_t = jnp.dot(w1t_ref[...], onehot_t,
                    preferred_element_type=jnp.float32)               # (10, TM)
    wb_t = jnp.tanh(acc_t + bias_ref[...])                            # (10, TM)

    # Stage 2: logits^T = s_weights^T @ hidden^T.
    logits_t = jnp.dot(w2t_ref[...], wb_t.astype(jnp.bfloat16),
                       preferred_element_type=jnp.float32)            # (27, TM)

    # exp WITHOUT max subtraction, matching the torch code exactly.
    ex = jnp.exp(logits_t)                                            # (27, TM)
    denom = jnp.sum(ex, axis=0, keepdims=True)                        # (1, TM)  sublane reduce
    r = pl.reciprocal(denom, approx=True)                             # EUP slot
    r = r * (2.0 - denom * r)                                         # 1 NR step -> ~f32 accurate
    out_ref[...] = ex * r                                             # lane-dense store


def neural_lm_forward_packed(packed_idx, w1_t, bias_t, w2_t, *, block_lanes=2048):
    """Forward from packed int32 indices packed_idx: (N,).  Returns (N, 27)."""
    n = packed_idx.shape[0]
    tm = max(128, min(_round_up(block_lanes, 128), _round_up(n, 128)))
    # Keep at least 2 grid steps whenever the batch allows it, so v7x's two
    # TensorCores can both work the ("parallel") batch axis.
    if n > 128:
        tm = min(tm, _round_up((n + 1) // 2, 128))
    n_pad = _round_up(n, tm)
    # Padded tail uses packed index 0 (chars 0,0,0): valid, finite math; sliced off.
    idx2d = jnp.pad(packed_idx.astype(jnp.int32), (0, n_pad - n)).reshape(1, n_pad)
    grid = (n_pad // tm,)

    cost = pl.CostEstimate(
        flops=int(2 * n_pad * (CTX * VOCAB * H_DIM + H_DIM * VOCAB)),
        transcendentals=int(n_pad * (H_DIM + VOCAB + 1)),
        bytes_accessed=int(4 * n_pad * (1 + VOCAB)
                           + 2 * (CTX * VOCAB * H_DIM + VOCAB * H_DIM)
                           + 4 * H_DIM),
    )

    out_t = pl.pallas_call(
        _neural_lm_kernel,
        out_shape=jax.ShapeDtypeStruct((VOCAB, n_pad), jnp.float32),
        grid_spec=pltpu.PrefetchScalarGridSpec(
            num_scalar_prefetch=0,
            grid=grid,
            in_specs=[
                pl.BlockSpec((1, tm), lambda i: (0, i)),                 # packed idx tile
                pl.BlockSpec((H_DIM, CTX * VOCAB), lambda i: (0, 0)),    # W1^T   (VMEM-resident)
                pl.BlockSpec((H_DIM, 1), lambda i: (0, 0)),              # bias^T (VMEM-resident)
                pl.BlockSpec((VOCAB, H_DIM), lambda i: (0, 0)),          # W2^T   (VMEM-resident)
            ],
            out_specs=pl.BlockSpec((VOCAB, tm), lambda i: (0, i)),       # lane-dense output
        ),
        compiler_params=pltpu.CompilerParams(
            dimension_semantics=("parallel",),   # batch tiles independent -> megacore / v7x 2 TCs
        ),
        cost_estimate=cost,
    )(idx2d, w1_t, bias_t, w2_t)
    # One transpose outside the kernel to hand back the (N, 27) the module API expects.
    return out_t[:, :n].T


def neural_lm_forward(x, embedding, weights, biases, s_weights, *, block_lanes=2048):
    """Drop-in forward matching NeuralLM.forward: x is one-hot (N, 3, 27) float32."""
    # One-hot -> packed integer indices: 4 B/row of kernel input HBM traffic.
    idx = jnp.argmax(x, axis=-1).astype(jnp.int32)                    # (N, 3)
    packed = idx[:, 0] | (idx[:, 1] << 5) | (idx[:, 2] << 10)         # (N,)

    # Fold embedding @ weights into an (81, 10) table (row r = 27*c + v holds
    # embedding[v] @ weights[5c:5c+5]); keep it transposed and in bf16 — the
    # MXU rounds DEFAULT-precision f32 operands to bf16 anyway.
    table = jnp.einsum(
        "ve,ceh->cvh", embedding, weights.reshape(CTX, CH_EMBED_DIM, H_DIM),
        preferred_element_type=jnp.float32).reshape(CTX * VOCAB, H_DIM)
    w1_t = table.T.astype(jnp.bfloat16)                               # (10, 81)
    bias_t = biases.reshape(H_DIM, 1).astype(jnp.float32)             # (10, 1)
    w2_t = s_weights.T.astype(jnp.bfloat16)                           # (27, 10)
    return neural_lm_forward_packed(packed, w1_t, bias_t, w2_t,
                                    block_lanes=block_lanes)


def init_params(key):
    """Deterministic synthetic parameters (shapes match NeuralLM.__init__)."""
    k_emb, k_w, k_b, k_sw = jax.random.split(key, 4)
    embedding = jax.random.normal(k_emb, (VOCAB, CH_EMBED_DIM), dtype=jnp.float32)
    weights = jax.random.normal(k_w, (CTX * CH_EMBED_DIM, H_DIM), dtype=jnp.float32)
    biases = jax.random.normal(k_b, (1, H_DIM), dtype=jnp.float32)
    s_weights = jax.random.normal(k_sw, (H_DIM, VOCAB), dtype=jnp.float32)
    return embedding, weights, biases, s_weights


def reference_forward(x, embedding, weights, biases, s_weights):
    """Pure-JAX reference mirroring the PyTorch forward exactly."""
    embeds = jnp.einsum("ncv,ve->nce", x, embedding)
    n = embeds.shape[0]
    embeds = embeds.reshape(n, -1)
    wb = jnp.tanh(embeds @ weights + biases)
    logits = jnp.exp(wb @ s_weights)
    return logits / jnp.sum(logits, axis=1, keepdims=True)


if __name__ == "__main__":
    key = jax.random.PRNGKey(0)
    k_params, k_idx = jax.random.split(key)

    embedding, weights, biases, s_weights = init_params(k_params)

    # Small deterministic input: 300 contexts of 3 one-hot characters.  With the
    # default tile this exercises the >=2-step grid and the padded-tail path.
    N = 300
    idx = jax.random.randint(k_idx, (N, CTX), 0, VOCAB)
    x = jax.nn.one_hot(idx, VOCAB, dtype=jnp.float32)                 # (N, 3, 27)

    out = neural_lm_forward(x, embedding, weights, biases, s_weights)
    out = jax.block_until_ready(out)

    ref = reference_forward(x, embedding, weights, biases, s_weights)
    assert out.shape == (N, VOCAB)
    # Rows are exact probability distributions (approx reciprocal + 1 NR step).
    assert jnp.allclose(jnp.sum(out, axis=1), jnp.ones((N,)), atol=1e-5)
    # Both the kernel and (on TPU) the pure-JAX reference run matmuls on the MXU
    # with bf16 operand rounding, and the folded embedding@weights table changes
    # the f32 summation order, so the probabilities agree to the bf16-matmul
    # noise floor (~1e-3..1e-2 absolute), not to f32 epsilon.
    assert jnp.allclose(out, ref, atol=1e-2, rtol=0.0)

    print("KERNEL_OK")
</pallas_src>

<mosaic_0001>
module attributes {stable_mosaic.version = 11 : i64} {
  func.func @_neural_lm_kernel(%arg0: i32, %arg1: memref<1x256xi32, #tpu.memory_space<vmem>>, %arg2: memref<10x81xbf16, #tpu.memory_space<vmem>>, %arg3: memref<10x1xf32, #tpu.memory_space<vmem>>, %arg4: memref<27x10xbf16, #tpu.memory_space<vmem>>, %arg5: memref<27x256xf32, #tpu.memory_space<vmem>>) attributes {dimension_semantics = [#tpu.dimension_semantics<parallel>], iteration_bounds = array<i64: 2>, scalar_prefetch = 0 : i64, scratch_operands = 0 : i64, tpu.core_type = #tpu.core_type<tc>, window_params = [{transform_indices = @transform_0, window_bounds = array<i64: 1, 256>}, {pipeline_mode = #tpu.pipeline_mode<synchronous>, transform_indices = @transform_1, window_bounds = array<i64: 10, 81>}, {pipeline_mode = #tpu.pipeline_mode<synchronous>, transform_indices = @transform_2, window_bounds = array<i64: 10, 1>}, {pipeline_mode = #tpu.pipeline_mode<synchronous>, transform_indices = @transform_3, window_bounds = array<i64: 27, 10>}, {transform_indices = @transform_4, window_bounds = array<i64: 27, 256>}]} {
    %c0 = arith.constant 0 : index
    %c0_0 = arith.constant 0 : index
    %0 = vector.load %arg1[%c0, %c0_0] : memref<1x256xi32, #tpu.memory_space<vmem>>, vector<1x256xi32>
    %c31_i32 = arith.constant 31 : i32
    %1 = vector.broadcast %c31_i32 : i32 to vector<1x256xi32>
    %2 = arith.andi %0, %1 : vector<1x256xi32>
    %c5_i32 = arith.constant 5 : i32
    %3 = vector.broadcast %c5_i32 : i32 to vector<1x256xi32>
    %4 = arith.shrsi %0, %3 : vector<1x256xi32>
    %c31_i32_1 = arith.constant 31 : i32
    %5 = vector.broadcast %c31_i32_1 : i32 to vector<1x256xi32>
    %6 = arith.andi %4, %5 : vector<1x256xi32>
    %c10_i32 = arith.constant 10 : i32
    %7 = vector.broadcast %c10_i32 : i32 to vector<1x256xi32>
    %8 = arith.shrsi %0, %7 : vector<1x256xi32>
    %c31_i32_2 = arith.constant 31 : i32
    %9 = vector.broadcast %c31_i32_2 : i32 to vector<1x256xi32>
    %10 = arith.andi %8, %9 : vector<1x256xi32>
    %11 = tpu.iota {dimensions = array<i32: 0>} : vector<81x256xi32>
    %12 = vector.broadcast %2 : vector<1x256xi32> to vector<81x256xi32>
    %13 = arith.cmpi eq, %11, %12 : vector<81x256xi32>
    %c27_i32 = arith.constant 27 : i32
    %14 = vector.broadcast %c27_i32 : i32 to vector<81x256xi32>
    %15 = arith.subi %11, %14 : vector<81x256xi32>
    %16 = vector.broadcast %6 : vector<1x256xi32> to vector<81x256xi32>
    %17 = arith.cmpi eq, %15, %16 : vector<81x256xi32>
    %18 = arith.ori %13, %17 : vector<81x256xi1>
    %c54_i32 = arith.constant 54 : i32
    %19 = vector.broadcast %c54_i32 : i32 to vector<81x256xi32>
    %20 = arith.subi %11, %19 : vector<81x256xi32>
    %21 = vector.broadcast %10 : vector<1x256xi32> to vector<81x256xi32>
    %22 = arith.cmpi eq, %20, %21 : vector<81x256xi32>
    %23 = arith.ori %18, %22 : vector<81x256xi1>
    %24 = arith.extui %23 : vector<81x256xi1> to vector<81x256xi32>
    %25 = arith.sitofp %24 : vector<81x256xi32> to vector<81x256xf32>
    %26 = arith.truncf %25 : vector<81x256xf32> to vector<81x256xbf16>
    %c0_3 = arith.constant 0 : index
    %c0_4 = arith.constant 0 : index
    %27 = vector.load %arg2[%c0_3, %c0_4] : memref<10x81xbf16, #tpu.memory_space<vmem>>, vector<10x81xbf16>
    %cst = arith.constant dense<0.000000e+00> : vector<10x256xf32>
    %28 = tpu.matmul %27, %26, %cst {dimension_numbers = #tpu.dot_dimension_numbers<[1], [0], [0], [1], [0, 0, 1, 1], [], []>} : vector<10x81xbf16>, vector<81x256xbf16>, vector<10x256xf32> -> vector<10x256xf32>
    %c0_5 = arith.constant 0 : index
    %c0_6 = arith.constant 0 : index
    %29 = vector.load %arg3[%c0_5, %c0_6] : memref<10x1xf32, #tpu.memory_space<vmem>>, vector<10x1xf32>
    %30 = vector.broadcast %29 : vector<10x1xf32> to vector<10x256xf32>
    %31 = arith.addf %28, %30 : vector<10x256xf32>
    %32 = math.tanh %31 : vector<10x256xf32>
    %c0_7 = arith.constant 0 : index
    %c0_8 = arith.constant 0 : index
    %33 = vector.load %arg4[%c0_7, %c0_8] : memref<27x10xbf16, #tpu.memory_space<vmem>>, vector<27x10xbf16>
    %34 = arith.truncf %32 : vector<10x256xf32> to vector<10x256xbf16>
    %cst_9 = arith.constant dense<0.000000e+00> : vector<27x256xf32>
    %35 = tpu.matmul %33, %34, %cst_9 {dimension_numbers = #tpu.dot_dimension_numbers<[1], [0], [0], [1], [0, 0, 1, 1], [], []>} : vector<27x10xbf16>, vector<10x256xbf16>, vector<27x256xf32> -> vector<27x256xf32>
    %36 = math.exp %35 : vector<27x256xf32>
    %cst_10 = arith.constant dense<0.000000e+00> : vector<256xf32>
    %37 = vector.multi_reduction <add>, %36, %cst_10 [0] : vector<27x256xf32> to vector<256xf32>
    %38 = vector.shape_cast %37 : vector<256xf32> to vector<1x256xf32>
    %39 = tpu.reciprocal %38 {approx = true} : vector<1x256xf32> -> vector<1x256xf32>
    %40 = arith.mulf %38, %39 : vector<1x256xf32>
    %cst_11 = arith.constant 2.000000e+00 : f32
    %41 = vector.broadcast %cst_11 : f32 to vector<1x256xf32>
    %42 = arith.subf %41, %40 : vector<1x256xf32>
    %43 = arith.mulf %39, %42 : vector<1x256xf32>
    %44 = vector.broadcast %43 : vector<1x256xf32> to vector<27x256xf32>
    %45 = arith.mulf %36, %44 : vector<27x256xf32>
    %c0_12 = arith.constant 0 : index
    %c0_13 = arith.constant 0 : index
    %46 = vector.load %arg5[%c0_12, %c0_13] : memref<27x256xf32, #tpu.memory_space<vmem>>, vector<27x256xf32>
    tpu.vector_store %arg5[%c0_12, %c0_13], %45 {strides = array<i32>} : memref<27x256xf32, #tpu.memory_space<vmem>>, vector<27x256xf32>,
    return
  }
  func.func @transform_0(%arg0: i32) -> (i32, i32) {
    %c0_i32 = arith.constant 0 : i32
    %c0_i32_0 = arith.constant 0 : i32
    return %c0_i32, %arg0 : i32, i32
  }
  func.func @transform_1(%arg0: i32) -> (i32, i32) {
    %c0_i32 = arith.constant 0 : i32
    %c0_i32_0 = arith.constant 0 : i32
    %c0_i32_1 = arith.constant 0 : i32
    return %c0_i32, %c0_i32_0 : i32, i32
  }
  func.func @transform_2(%arg0: i32) -> (i32, i32) {
    %c0_i32 = arith.constant 0 : i32
    %c0_i32_0 = arith.constant 0 : i32
    %c0_i32_1 = arith.constant 0 : i32
    return %c0_i32, %c0_i32_0 : i32, i32
  }
  func.func @transform_3(%arg0: i32) -> (i32, i32) {
    %c0_i32 = arith.constant 0 : i32
    %c0_i32_0 = arith.constant 0 : i32
    %c0_i32_1 = arith.constant 0 : i32
    return %c0_i32, %c0_i32_0 : i32, i32
  }
  func.func @transform_4(%arg0: i32) -> (i32, i32) {
    %c0_i32 = arith.constant 0 : i32
    %c0_i32_0 = arith.constant 0 : i32
    return %c0_i32, %arg0 : i32, i32
  }
}

</mosaic_0001>

<bundles_post_ra>
// kernel: tpu_custom_call.1
= control target key start
LH: loop header
LB: loop body
LE: loop exit
PB: predicated region body
PF: predicated region fallthrough
CT: control target
= control target key end

     0   :  { %9 = vsyncpa [#allocation3], 0  ;;  %s1163_s0 = inlined_call_operand.vmem [shape: s32[1,512], index: 0, kind: input, shape index: {}]   ;;  %s1164_s1 = inlined_call_operand.vmem [shape: bf16[10,81], index: 1, kind: input, shape index: {}]   ;;  %s1165_s2 = inlined_call_operand.vmem [shape: f32[10,1], index: 2, kind: input, shape index: {}]   ;;  %s1166_s3 = inlined_call_operand.vmem [shape: bf16[27,10], index: 3, kind: input, shape index: {}]   ;;  %s1167_s4 = inlined_call_operand.hbm [shape: f32[27,512], index: 4, kind: output, shape index: {}]  }
   0x1   :  { %11 = vsyncpa [#allocation3 + $0x1], 0  ;;  %s943_s15 = smov 0   ;;  %s945_s16 = smov 0  }
   0x2   :  { %s947_s17 = smov 0   ;;  %s949_s18 = smov 0  }
   0x3 LB: > { %s964_s19 = sadd.s32 4294967295, %s910_s18   ;;  %s677_s20 = sadd.s32 4294967294, %s910_s18   ;;  %s910_s18 = sphi %s949_s18, %s1175_s18   ;;  %s906_s17 = sphi %s947_s17, %s1174_s17   ;;  %s902_s16 = sphi %s945_s16, %s1173_s16   ;;  %s898_s15 = sphi %s943_s15, %s1172_s15  }
   0x4   : > { %s968_s21 = sadd.s32 1, %s910_s18   ;;  %s113_s22 = sadd.s32 1, %s906_s17 }
   0x5   : > { %s110_s23 = ssub.s32 %s910_s18, %s968_s21  ;;  %p123_p0 = scmp.ne.s32.totalorder %s906_s17, %s902_s16 }
   0x6   : > { %p111_p1 = scmp.eq.s32.totalorder %s110_s23, 0  ;;  %p124_p2 = scmp.eq.s32.totalorder %s964_s19, 1 }
   0x7   : > { %p129_p3 = scmp.ne.s32.totalorder %s902_s16, %s898_s15  ;;  %p130_p4 = scmp.eq.s32.totalorder %s677_s20, 1 }
   0x8   : > { %s979_s24 = scalar_select %p111_p1, %s906_s17, %s113_s22  }
   0x9   : > { %p981_p5 = por %p124_p2, %p123_p0  ;;  %p985_p6 = por %p130_p4, %p129_p3 }
   0xa   : > { %p680_p7 = scmp.ge.s32.totalorder %s910_s18, 1  ;;  %p165_p8 = scmp.lt.s32.totalorder %s910_s18, 3 }
   0xc   : > { %p166_p9 = pnand %p680_p7, %p165_p8 }
   0xd   : > { %s682_s27 = sshll.u32 (!%p166_p9), %s964_s19, 1  ;;  %s187_s28 = sand.u32 (!%p166_p9), 1, %s902_s16  }
   0xe   : > { %169 = sbr.rel (%p166_p9) target bundleno = 438 (0x1b6), region = 36  ;;  %p191_p10 = scmp.lt.s32.totalorder (!%p166_p9), %s682_s27, 3 }
   0xf   : > { %s681_s29 = sshll.u32 (!%p166_p9), %s187_s28, 6  ;;  %s868_s20 = scalar_lea.hbm (!%p166_p9), %s1167_s4, 128 }
  0x10   : > { %s189_s8 = scalar_lea.vmem (!%p166_p9), [#allocation2], %s681_s29 }
  0x11   : > { %s615_s9 = sshll.u32 (!%p166_p9), %s189_s8, 4  ;;  %s616_s9 = int_to_ptr.vmem [resolvable:$true] %s615_s9 }
  0x13   : > { %v203_v0 = vlaneseq  ;;  %v912_v1 = vmov 0   ;;  %s1177_s27 = smov (!%p191_p10, %s682_s27), 3  ;;  %vm432_vm1 = vcmask 1040384   ;;  %v913_v24 = vmov 0.0   ;;  %v411_v48 = vld [vmem:[%s1165_s2] sm:$0xff] }
  0x14   : > { %819 = vset.pattern.permute.xlu0 %v912_v1  ;;  %s193_s30 = scalar_lea.vmem %s1163_s0, %s1177_s27  ;;  %v434_v26 = vsel %vm432_vm1, 65535, %v912_v1  ;;  %v914_v39 = vmov 1.0|1.0   ;;  %v412_v53 = vld [vmem:[%s1165_s2 + $0x8] sm:$0x3] }
  0x15   : > { %v992_v2 = vshrl.u32 %v203_v0, 7  ;;  %v197_v4 = vld [vmem:[%s193_s30] sm:$0x3]  ;;  %415 = vperm.xlu0 %819, %v411_v48   ;;  %v770_v60 = vld [vmem:[%s1164_s1] sm:$0x10]  ;;  %s773_s30 = sshll.u32 %s964_s19, 4 }
  0x16   : > { %v198_v5 = vand.u32 31, %v197_v4  ;;  %v199_v6 = vshra.s32 %v197_v4, 5  ;;  %v201_v7 = vshra.s32 %v197_v4, 10  ;;  %v729_v59 = vld [vmem:[%s1164_s1] sm:$0xf]  ;;  %s614_s7 = scalar_lea.hbm %s1167_s4, %s773_s30  ;;  %s603_s19 = scalar_lea.sflag [#allocation3], %s187_s28 }
  0x17   : > { %v214_v3 = vadd.s32 80, %v992_v2  ;;  %v212_v8 = vadd.s32 64, %v992_v2  ;;  %v213_v11 = vadd.s32 72, %v992_v2  ;;  %v210_v28 = vadd.s32 48, %v992_v2  ;;  %s617_s10 = sshll.u32 %s614_s7, 4  ;;  %s618_s10 = int_to_ptr.hbm [resolvable:$true] %s617_s10 }
  0x18   : > { %v200_v12 = vand.u32 31, %v199_v6  ;;  %v202_v13 = vand.u32 31, %v201_v7  ;;  %v1000_v14 = vperm.slane %v198_v5, 0  ;;  %v1002_v15 = vperm.slane %v198_v5, 1  ;;  %s862_s11 = sshra.s32 %s618_s10, 4  ;;  %s863_s11 = int_to_ptr.hbm [resolvable:$true] %s862_s11 }
  0x19   : > { %v693_v9 = vadd.s32 4294967269, %v214_v3  ;;  %v704_v10 = vadd.s32 4294967242, %v214_v3  ;;  %v691_v18 = vadd.s32 4294967269, %v212_v8  ;;  %v692_v21 = vadd.s32 4294967269, %v213_v11  ;;  %s864_s12 = scalar_lea.hbm %s863_s11, 64  ;;  %p869_p0 = scmp.lt.s32.totalorder %s863_s11, %s1167_s4 }
  0x1a   : > { %vm237_vm0 = vcmp.eq.s32.totalorder %v214_v3, %v1000_v14  ;;  %v1005_v16 = vperm.slane %v200_v12, 0  ;;  %v1007_v17 = vperm.slane %v202_v13, 0  ;;  %v1009_v19 = vperm.slane %v200_v12, 1  ;;  %v771_v12 = vld [vmem:[%s1166_s3] sm:$0xff]  ;;  %p865_p11 = scmp.ne.s32.totalorder %s863_s11, %s864_s12  ;;  %p870_p1 = scmp.lt.s32.totalorder %s868_s20, %s864_s12 }
  0x1b   : > { %v1011_v20 = vperm.slane %v202_v13, 1  ;;  %vm238_vm4 = vcmp.eq.s32.totalorder %v214_v3, %v1002_v15  ;;  %v702_v22 = vadd.s32 4294967242, %v212_v8  ;;  %v703_v23 = vadd.s32 4294967242, %v213_v11 }
  0x1c   : > { %vm272_vm2 = vcmp.eq.s32.totalorder %v693_v9, %v1005_v16  ;;  %vm329_vm3 = vcmp.eq.s32.totalorder %v704_v10, %v1007_v17  ;;  %vm273_vm6 = vcmp.eq.s32.totalorder %v693_v9, %v1009_v19  ;;  %vm233_vm9 = vcmp.eq.s32.totalorder %v212_v8, %v1000_v14  ;;  %p866_p12 = pnand %p865_p11, %p981_p5  ;;  %p871_p2 = por %p870_p1, %p869_p0 }
  0x1d   : > { %vm294_vm5 = vmor %vm237_vm0, %vm272_vm2  ;;  %vm330_vm7 = vcmp.eq.s32.totalorder %v704_v10, %v1011_v20  ;;  %vm268_vm10 = vcmp.eq.s32.totalorder %v691_v18, %v1005_v16  ;;  %vm235_vm12 = vcmp.eq.s32.totalorder %v213_v11, %v1000_v14  ;;  %vm270_vm13 = vcmp.eq.s32.totalorder %v692_v21, %v1005_v16  ;;  %420 = vperm.xlu0 %819, %v412_v53  }
  0x1e   : > { %vm351_vm8 = vmor %vm294_vm5, %vm329_vm3  ;;  %vm325_vm15 = vcmp.eq.s32.totalorder %v702_v22, %v1007_v17  ;;  %vm327_vm2 = vcmp.eq.s32.totalorder %v703_v23, %v1007_v17  ;;  %v211_v30 = vadd.s32 56, %v992_v2  ;;  %vm269_vm5 = vcmp.eq.s32.totalorder %v691_v18, %v1009_v19  ;;  %v772_v18 = vld [vmem:[%s1166_s3 + $0x8] sm:$0x30]  ;;  %p867_p13 = pneg %p866_p12 }
  0x1f   : > { %v725_v25 = vsel %vm351_vm8, 1.0, %v913_v24  ;;  %vm295_vm11 = vmor %vm238_vm4, %vm273_vm6  ;;  %vm234_vm4 = vcmp.eq.s32.totalorder %v212_v8, %v1002_v15  ;;  %vm271_vm8 = vcmp.eq.s32.totalorder %v692_v21, %v1009_v19  ;;  %v689_v35 = vadd.s32 4294967269, %v210_v28 }
  0x20   : > { %v407_v27 = vpack.c.bf16 %v725_v25, %v725_v25  ;;  %vm352_vm14 = vmor %vm295_vm11, %vm330_vm7  ;;  %vm236_vm7 = vcmp.eq.s32.totalorder %v213_v11, %v1002_v15  ;;  %v690_v36 = vadd.s32 4294967269, %v211_v30  ;;  %v700_v37 = vadd.s32 4294967242, %v210_v28  ;;  %p872_p3 = pnand %p871_p2, %p867_p13 }
  0x21   : > { %v726_v29 = vsel %vm352_vm14, 1.0, %v913_v24  ;;  %vm290_vm0 = vmor %vm233_vm9, %vm268_vm10  ;;  %vm326_vm10 = vcmp.eq.s32.totalorder %v702_v22, %v1011_v20  ;;  %v701_v38 = vadd.s32 4294967242, %v211_v30  ;;  %v208_v40 = vadd.s32 32, %v992_v2 }
  0x22   : > { %v436_v31 = vand.u32 %v434_v26, %v407_v27  ;;  %v408_v32 = vpack.c.bf16 %v726_v29, %v726_v29  ;;  %vm292_vm1 = vmor %vm235_vm12, %vm270_vm13  ;;  %vm328_vm12 = vcmp.eq.s32.totalorder %v703_v23, %v1011_v20  ;;  %v209_v41 = vadd.s32 40, %v992_v2 }
  0x23   : > { %vm1027_vm3 = vmor %vm290_vm0, %vm325_vm15  ;;  %vm229_vm15 = vcmp.eq.s32.totalorder %v210_v28, %v1000_v14  ;;  %vm264_vm0 = vcmp.eq.s32.totalorder %v689_v35, %v1005_v16  ;;  %v687_v42 = vadd.s32 4294967269, %v208_v40  ;;  %v698_v44 = vadd.s32 4294967242, %v208_v40 }
  0x24   : > { %443 = vmatpush.bf16.msra.mxu0 %v436_v31  ;;  %v439_v34 = vand.u32 %v434_v26, %v408_v32  ;;  %vm349_vm6 = vmor %vm292_vm1, %vm327_vm2  ;;  %vm231_vm1 = vcmp.eq.s32.totalorder %v211_v30, %v1000_v14  ;;  %v688_v43 = vadd.s32 4294967269, %v209_v41  ;;  %v699_v45 = vadd.s32 4294967242, %v209_v41 }
  0x25   : > { %vm731_vm9 = vmpackc.low %vm349_vm6, %vm1027_vm3  ;;  %vm266_vm3 = vcmp.eq.s32.totalorder %v690_v36, %v1005_v16  ;;  %v206_v46 = vadd.s32 16, %v992_v2  ;;  %v207_v47 = vadd.s32 24, %v992_v2  ;;  %v205_v54 = vadd.s32 8, %v992_v2 }
  0x26   : > { %457 = vmatpush.bf16.msra.mxu1 %v439_v34  ;;  %vm291_vm11 = vmor %vm234_vm4, %vm269_vm5  ;;  %vm321_vm4 = vcmp.eq.s32.totalorder %v700_v37, %v1007_v17  ;;  %v683_v55 = vadd.s32 4294967269, %v992_v2  ;;  %v694_v57 = vadd.s32 4294967242, %v992_v2  ;;  %v730_v61 = vor.u32 %v770_v60, %v729_v59 }
  0x27   : > { %vm293_vm13 = vmor %vm236_vm7, %vm271_vm8  ;;  %vm323_vm7 = vcmp.eq.s32.totalorder %v701_v38, %v1007_v17  ;;  %v685_v49 = vadd.s32 4294967269, %v206_v46  ;;  %v686_v50 = vadd.s32 4294967269, %v207_v47  ;;  %v696_v51 = vadd.s32 4294967242, %v206_v46 }
  0x28   : > { %732 = vmatpush.bf16.msk.msra.mxu0 %vm731_vm9, %v914_v39  ;;  %vm348_vm14 = vmor %vm291_vm11, %vm326_vm10  ;;  %vm230_vm10 = vcmp.eq.s32.totalorder %v210_v28, %v1002_v15  ;;  %vm265_vm11 = vcmp.eq.s32.totalorder %v689_v35, %v1009_v19  ;;  %v697_v52 = vadd.s32 4294967242, %v207_v47  ;;  %v684_v56 = vadd.s32 4294967269, %v205_v54 }
  0x29   : > { %vm350_vm2 = vmor %vm293_vm13, %vm328_vm12  ;;  %vm232_vm13 = vcmp.eq.s32.totalorder %v211_v30, %v1002_v15  ;;  %v695_v58 = vadd.s32 4294967242, %v205_v54 }
  0x2a   : > { %vm742_vm6 = vmpackc.low %vm350_vm2, %vm348_vm14  ;;  %vm267_vm14 = vcmp.eq.s32.totalorder %v690_v36, %v1009_v19 }
  0x2b   : > { %743 = vmatpush.bf16.msk.msra.mxu1 %vm742_vm6, %v914_v39  ;;  %vm286_vm5 = vmor %vm229_vm15, %vm264_vm0  ;;  %vm322_vm6 = vcmp.eq.s32.totalorder %v700_v37, %v1011_v20  ;;  %vm324_vm0 = vcmp.eq.s32.totalorder %v701_v38, %v1011_v20 }
  0x2c   : > { %vm288_vm8 = vmor %vm231_vm1, %vm266_vm3 }
  0x2d   : > { %vm343_vm9 = vmor %vm286_vm5, %vm321_vm4  ;;  %vm225_vm4 = vcmp.eq.s32.totalorder %v208_v40, %v1000_v14  ;;  %vm260_vm5 = vcmp.eq.s32.totalorder %v687_v42, %v1005_v16 }
  0x2e   : > { %vm345_vm12 = vmor %vm288_vm8, %vm323_vm7  ;;  %vm227_vm8 = vcmp.eq.s32.totalorder %v209_v41, %v1000_v14 }
  0x2f   : > { %vm733_vm2 = vmpackc.low %vm345_vm12, %vm343_vm9  ;;  %vm262_vm9 = vcmp.eq.s32.totalorder %v688_v43, %v1005_v16 }
  0x30   : > { %734 = vmatpush.bf16.msk.msra.mxu0 %vm733_vm2, %v914_v39  ;;  %vm287_vm15 = vmor %vm230_vm10, %vm265_vm11  ;;  %vm317_vm2 = vcmp.eq.s32.totalorder %v698_v44, %v1007_v17  ;;  %vm319_vm11 = vcmp.eq.s32.totalorder %v699_v45, %v1007_v17 }
  0x31   : > { %vm289_vm1 = vmor %vm232_vm13, %vm267_vm14 }
  0x32   : > { %vm344_vm3 = vmor %vm287_vm15, %vm322_vm6  ;;  %vm226_vm6 = vcmp.eq.s32.totalorder %v208_v40, %v1002_v15  ;;  %vm261_vm15 = vcmp.eq.s32.totalorder %v687_v42, %v1009_v19 }
  0x33   : > { %vm346_vm7 = vmor %vm289_vm1, %vm324_vm0  ;;  %vm228_vm1 = vcmp.eq.s32.totalorder %v209_v41, %v1002_v15 }
  0x34   : > { %vm744_vm12 = vmpackc.low %vm346_vm7, %vm344_vm3  ;;  %vm263_vm3 = vcmp.eq.s32.totalorder %v688_v43, %v1009_v19 }
  0x35   : > { %745 = vmatpush.bf16.msk.msra.mxu1 %vm744_vm12, %v914_v39  ;;  %vm282_vm10 = vmor %vm225_vm4, %vm260_vm5  ;;  %vm318_vm5 = vcmp.eq.s32.totalorder %v698_v44, %v1011_v20 }
  0x36   : > { %vm284_vm13 = vmor %vm227_vm8, %vm262_vm9  ;;  %vm320_vm8 = vcmp.eq.s32.totalorder %v699_v45, %v1011_v20 }
  0x37   : > { %vm339_vm14 = vmor %vm282_vm10, %vm317_vm2  ;;  %vm221_vm2 = vcmp.eq.s32.totalorder %v206_v46, %v1000_v14  ;;  %vm256_vm10 = vcmp.eq.s32.totalorder %v685_v49, %v1005_v16 }
  0x38   : > { %vm341_vm0 = vmor %vm284_vm13, %vm319_vm11  ;;  %vm223_vm13 = vcmp.eq.s32.totalorder %v207_v47, %v1000_v14 }
  0x39   : > { %vm735_vm4 = vmpackc.low %vm341_vm0, %vm339_vm14  ;;  %vm258_vm14 = vcmp.eq.s32.totalorder %v686_v50, %v1005_v16 }
  0x3a   : > { %736 = vmatpush.bf16.msk.msra.mxu0 %vm735_vm4, %v914_v39  ;;  %vm283_vm7 = vmor %vm226_vm6, %vm261_vm15  ;;  %vm313_vm15 = vcmp.eq.s32.totalorder %v696_v51, %v1007_v17 }
  0x3b   : > { %vm285_vm9 = vmor %vm228_vm1, %vm263_vm3  ;;  %vm315_vm1 = vcmp.eq.s32.totalorder %v697_v52, %v1007_v17 }
  0x3c   : > { %vm340_vm12 = vmor %vm283_vm7, %vm318_vm5  ;;  %vm222_vm5 = vcmp.eq.s32.totalorder %v206_v46, %v1002_v15  ;;  %vm257_vm7 = vcmp.eq.s32.totalorder %v685_v49, %v1009_v19 }
  0x3d   : > { %vm342_vm11 = vmor %vm285_vm9, %vm320_vm8  ;;  %vm224_vm9 = vcmp.eq.s32.totalorder %v207_v47, %v1002_v15 }
  0x3e   : > { %vm746_vm6 = vmpackc.low %vm342_vm11, %vm340_vm12  ;;  %vm259_vm12 = vcmp.eq.s32.totalorder %v686_v50, %v1009_v19 }
  0x3f   : > { %747 = vmatpush.bf16.msk.msra.mxu1 %vm746_vm6, %v914_v39  ;;  %vm278_vm0 = vmor %vm221_vm2, %vm256_vm10  ;;  %vm314_vm2 = vcmp.eq.s32.totalorder %v696_v51, %v1011_v20 }
  0x40   : > { %vm280_vm3 = vmor %vm223_vm13, %vm258_vm14  ;;  %vm316_vm13 = vcmp.eq.s32.totalorder %v697_v52, %v1011_v20 }
  0x41   : > { %vm335_vm4 = vmor %vm278_vm0, %vm313_vm15  ;;  %vm217_vm15 = vcmp.eq.s32.totalorder %v992_v2, %v1000_v14  ;;  %vm252_vm0 = vcmp.eq.s32.totalorder %v683_v55, %v1005_v16 }
  0x42   : > { %vm337_vm8 = vmor %vm280_vm3, %vm315_vm1  ;;  %vm219_vm3 = vcmp.eq.s32.totalorder %v205_v54, %v1000_v14 }
  0x43   : > { %vm737_vm11 = vmpackc.low %vm337_vm8, %vm335_vm4  ;;  %vm254_vm4 = vcmp.eq.s32.totalorder %v684_v56, %v1005_v16 }
  0x44   : > { %738 = vmatpush.bf16.msk.msra.mxu0 %vm737_vm11, %v914_v39  ;;  %vm279_vm10 = vmor %vm222_vm5, %vm257_vm7  ;;  %vm309_vm5 = vcmp.eq.s32.totalorder %v694_v57, %v1007_v17 }
  0x45   : > { %vm281_vm14 = vmor %vm224_vm9, %vm259_vm12  ;;  %vm311_vm9 = vcmp.eq.s32.totalorder %v695_v58, %v1007_v17  ;;  %v759_v17 = vld [vmem:[%s1166_s3 + $0x8] sm:$0xf] }
  0x46   : > { %vm336_vm6 = vmor %vm279_vm10, %vm314_vm2  ;;  %vm218_vm2 = vcmp.eq.s32.totalorder %v992_v2, %v1002_v15  ;;  %vm253_vm10 = vcmp.eq.s32.totalorder %v683_v55, %v1009_v19 }
  0x47   : > { %vm338_vm1 = vmor %vm281_vm14, %vm316_vm13  ;;  %vm220_vm14 = vcmp.eq.s32.totalorder %v205_v54, %v1002_v15 }
  0x48   : > { %vm748_vm8 = vmpackc.low %vm338_vm1, %vm336_vm6  ;;  %vm255_vm6 = vcmp.eq.s32.totalorder %v684_v56, %v1009_v19  ;;  %v760_v19 = vor.u32 %v772_v18, %v759_v17 }
  0x49   : > { %749 = vmatpush.bf16.msk.msra.mxu1 %vm748_vm8, %v914_v39  ;;  %vm274_vm7 = vmor %vm217_vm15, %vm252_vm0  ;;  %vm310_vm0 = vcmp.eq.s32.totalorder %v694_v57, %v1011_v20 }
  0x4a   : > { %vm276_vm12 = vmor %vm219_vm3, %vm254_vm4  ;;  %vm312_vm3 = vcmp.eq.s32.totalorder %v695_v58, %v1011_v20  ;;  %vm428_vm4 = vcmask 662528  }
  0x4b   : > { %vm331_vm11 = vmor %vm274_vm7, %vm309_vm5 }
  0x4c   : > { %vm333_vm13 = vmor %vm276_vm12, %vm311_vm9  ;;  %vm496_vm12 = vcmask 1044480  }
  0x4d   : > { %vm739_vm15 = vmpackc.low %vm333_vm13, %vm331_vm11  ;;  %vm489_vm11 = vcmask 80896  }
  0x4e   : > { %740 = vmatpush.bf16.msk.msra.mxu0 %vm739_vm15, %v914_v39  ;;  %vm275_vm1 = vmor %vm218_vm2, %vm253_vm10  ;;  %vm559_vm2 = vcmask 1042432  }
  0x4f   : > { %vm277_vm8 = vmor %vm220_vm14, %vm255_vm6 }
  0x50   : > { %vm332_vm5 = vmor %vm275_vm1, %vm310_vm0 }
  0x51   : > { %vm334_vm7 = vmor %vm277_vm8, %vm312_vm3  ;;  %741 = vmatmul.msk.bf16.vlgmr.msra.gmra.mxu0 %vm428_vm4, %v730_v61 }
  0x52   : > { %vm750_vm9 = vmpackc.low %vm334_vm7, %vm332_vm5 }
  0x53   : > { %751 = vmatpush.bf16.msk.msra.mxu1 %vm750_vm9, %v914_v39 }
  0x56   : > { %752 = vmatmul.msk.bf16.vlgmr.msra.gmra.mxu1 %vm428_vm4, %v730_v61 }
  0x87   : > { %v416_v62 = vpop.permute.xlu0 %415 }
  0x8f   : > { %v421_v2 = vpop.permute.xlu0 %420 }
  0xce   : > { %v450_v63 = vpop.f32.mrf.mxu0 }
  0xcf   : > { %v451_v1 = vadd.f32 %v450_v63, %v416_v62 }
  0xd1   : > { %820 = vtanh.f32 %v451_v1 }
  0xd3   : > { %v464_v0 = vpop.f32.mrf.mxu1 }
  0xd4   : > { %v465_v5 = vadd.f32 %v464_v0, %v416_v62 }
  0xd6   : > { %v452_v3 = vpop.f32.mrf.mxu0 }
  0xd7   : > { %v453_v4 = vadd.f32 %v452_v3, %v421_v2  ;;  %v821_v8 = vpop.eup %820 }
  0xd9   : > { %822 = vtanh.f32 %v453_v4 }
  0xda   : > { %824 = vtanh.f32 %v465_v5 }
  0xdb   : > { %v466_v6 = vpop.f32.mrf.mxu1 }
  0xdc   : > { %v467_v7 = vadd.f32 %v466_v6, %v421_v2 }
  0xde   : > { %826 = vtanh.f32 %v467_v7 }
  0xdf   : > { %v823_v9 = vpop.eup %822 }
  0xe0   : > { %v477_v10 = vpack.c.bf16 %v823_v9, %v821_v8  ;;  %v825_v13 = vpop.eup %824 }
  0xe2   : > { %v498_v11 = vsel %vm496_vm12, %v477_v10, 0 }
  0xe3   : > { %510 = vmatpush.bf16.msra.mxu2 %v498_v11 }
  0xe4   : > { %v827_v14 = vpop.eup %826 }
  0xe5   : > { %v478_v15 = vpack.c.bf16 %v827_v14, %v825_v13 }
  0xe6   : > { %761 = vmatmul.msk.bf16.vlgmr.msra.gmra.mxu2 %vm489_vm11, %v771_v12 }
  0xe7   : > { %v501_v16 = vsel %vm496_vm12, %v478_v15, 0 }
  0xe8   : > { %529 = vmatpush.bf16.msra.mxu3 %v501_v16 }
  0xeb   : > { %763 = vmatmul.msk.bf16.vlgmr.msra.gmra.mxu3 %vm489_vm11, %v771_v12 }
  0xf6   : > { %762 = vmatmul.msk.bf16.gmra.mxu2 %vm489_vm11, %v760_v19 }
  0xfb   : > { %764 = vmatmul.msk.bf16.gmra.mxu3 %vm489_vm11, %v760_v19 }
 0x169   : > { %v512_v20 = vpop.f32.mrf.mxu2 }
 0x16a   : > { %v541_v26 = vmul.f32 1.442695, %v512_v20 }
 0x16e   : > { %v531_v21 = vpop.f32.mrf.mxu3 }
 0x16f   : > { %v543_v30 = vmul.f32 1.442695, %v531_v21 }
 0x171   : > { %v514_v22 = vpop.f32.mrf.mxu2 }
 0x172   : > { %v545_v25 = vmul.f32 1.442695, %v514_v22 }
 0x174   : > { %828 = vpow2.f32 %v545_v25 }
 0x175   : > { %830 = vpow2.f32 %v541_v26 }
 0x176   : > { %v533_v23 = vpop.f32.mrf.mxu3 }
 0x177   : > { %v547_v29 = vmul.f32 1.442695, %v533_v23 }
 0x179   : > { %v517_v24 = vpop.f32.mrf.mxu2 }
 0x17a   : > { %v549_v27 = vmul.f32 1.442695, %v517_v24  ;;  %v829_v34 = vpop.eup %828 }
 0x17b   : > { %v831_v35 = vpop.eup %830 }
 0x17c   : > { %832 = vpow2.f32 %v549_v27  ;;  %v557_v39 = vadd.f32 %v831_v35, %v829_v34 }
 0x17d   : > { %834 = vpow2.f32 %v547_v29 }
 0x17e   : > { %v536_v28 = vpop.f32.mrf.mxu3 }
 0x17f   : > { %v551_v32 = vmul.f32 1.442695, %v536_v28 }
 0x181   : > { %v519_v31 = vpop.f32.mrf.mxu2 }
 0x182   : > { %v553_v33 = vmul.f32 1.442695, %v519_v31  ;;  %v833_v37 = vpop.eup %832 }
 0x183   : > { %v835_v40 = vpop.eup %834  ;;  %v558_v42 = vadd.f32 %v833_v37, %v557_v39 }
 0x184   : > { %836 = vpow2.f32 %v553_v33 }
 0x185   : > { %838 = vpow2.f32 %v543_v30 }
 0x186   : > { %840 = vpow2.f32 %v551_v32  ;;  %v538_v36 = vpop.f32.mrf.mxu3 }
 0x187   : > { %v555_v38 = vmul.f32 1.442695, %v538_v36 }
 0x189   : > { %842 = vpow2.f32 %v555_v38 }
 0x18a   : > { %v837_v41 = vpop.eup %836 }
 0x18b   : > { %v839_v43 = vpop.eup %838  ;;  %v560_v44 = vsel %vm559_vm2, %v837_v41, 0.0 }
 0x18c   : > { %v841_v45 = vpop.eup %840  ;;  %v561_v46 = vadd.f32 %v560_v44, %v558_v42  ;;  %v568_v47 = vadd.f32 %v839_v43, %v835_v40 }
 0x18e   : > { %v562_v48 = vrot.slane %v561_v46, 4  ;;  %v569_v50 = vadd.f32 %v841_v45, %v568_v47 }
 0x18f   : > { %v843_v49 = vpop.eup %842 }
 0x190   : > { %v563_v51 = vadd.f32 %v562_v48, %v561_v46  ;;  %v570_v52 = vsel %vm559_vm2, %v843_v49, 0.0 }
 0x191   : > { %v571_v53 = vadd.f32 %v570_v52, %v569_v50 }
 0x192   : > { %v564_v54 = vrot.slane %v563_v51, 2 }
 0x193   : > { %v572_v55 = vrot.slane %v571_v53, 4 }
 0x194   : > { %v565_v56 = vadd.f32 %v564_v54, %v563_v51 }
 0x195   : > { %v573_v57 = vadd.f32 %v572_v55, %v571_v53 }
 0x196   : > { %v566_v58 = vrot.slane %v565_v56, 1 }
 0x197   : > { %v574_v59 = vrot.slane %v573_v57, 2 }
 0x198   : > { %v567_v60 = vadd.f32 %v566_v58, %v565_v56 }
 0x199   : > { %v575_v61 = vadd.f32 %v574_v59, %v573_v57 }
 0x19a   : > { %844 = vrcp.f32 %v567_v60 }
 0x19b   : > { %v576_v62 = vrot.slane %v575_v61, 1 }
 0x19d   : > { %v577_v63 = vadd.f32 %v576_v62, %v575_v61 }
 0x19f   : > { %846 = vrcp.f32 %v577_v63 }
 0x1a0   : > { %v845_v0 = vpop.eup %844 }
 0x1a1   : > { %v580_v1 = vmul.f32 %v845_v0, %v567_v60 }
 0x1a3   : > { %v582_v2 = vsub.f32 2.0, %v580_v1 }
 0x1a5   : > { %v847_v3 = vpop.eup %846  ;;  %v584_v4 = vmul.f32 %v845_v0, %v582_v2 }
 0x1a6   : > { %v581_v5 = vmul.f32 %v847_v3, %v577_v63 }
 0x1a7   : > { %v586_v6 = vmul.f32 %v831_v35, %v584_v4  ;;  %v588_v7 = vmul.f32 %v829_v34, %v584_v4  ;;  %v590_v8 = vmul.f32 %v833_v37, %v584_v4  ;;  %v592_v9 = vmul.f32 %v837_v41, %v584_v4 }
 0x1a8   : > { %v583_v10 = vsub.f32 2.0, %v581_v5 }
 0x1a9   : > { %594 = vst [vmem:[%s189_s8] sm:$0xff] %v586_v6 }
 0x1aa   : > { %596 = vst [vmem:[%s189_s8 + $0x10] sm:$0xff] %v588_v7  ;;  %v585_v11 = vmul.f32 %v847_v3, %v583_v10 }
 0x1ab   : > { %598 = vst [vmem:[%s189_s8 + $0x20] sm:$0xff] %v590_v8 }
 0x1ac   : > { %600 = vst [vmem:[%s189_s8 + $0x30] sm:$0x7] %v592_v9  ;;  %v587_v12 = vmul.f32 %v839_v43, %v585_v11  ;;  %v589_v13 = vmul.f32 %v835_v40, %v585_v11  ;;  %v591_v14 = vmul.f32 %v841_v45, %v585_v11  ;;  %v593_v15 = vmul.f32 %v843_v49, %v585_v11 }
 0x1ae   : > { %595 = vst [vmem:[%s189_s8 + $0x8] sm:$0xff] %v587_v12 }
 0x1af   : > { %597 = vst [vmem:[%s189_s8 + $0x18] sm:$0xff] %v589_v13 }
 0x1b0   : > { %599 = vst [vmem:[%s189_s8 + $0x28] sm:$0xff] %v591_v14 }
 0x1b1   : > { %601 = vst [vmem:[%s189_s8 + $0x38] sm:$0x7] %v593_v15 }
 0x1b2   : > { %875 = shalt.err (!%p872_p3)
}
 0x1b3   : > { %s915_s27 = smov 256   ;;  %s916_s28 = smov 512  }
 0x1b4   : > { %s917_s29 = smov 16  }
 0x1b5   : > { %774 = dma.vmem_to_hbm [thread:$0]  (%p981_p5), %s616_s9, 1024, %s618_s10, %s603_s19, %s915_s27, %s916_s28, %s917_s29  }
 0x1b6 PF: > { %p780_p4 = scmp.ge.s32.totalorder %s910_s18, 2  ;;  %s632_s30 = sand.u32 1, %s898_s15  }
 0x1b7   : > { %s633_s5 = scalar_lea.sflag [#allocation3], %s632_s30 }
 0x1b8   : > { %p777_p7 = pnand %p780_p4, %p985_p6 }
 0x1ba   : > { %p778_p8 = pneg %p777_p7 }
 0x1bc   : > { %893 = dma.done.wait (%p778_p8), %s633_s5, 1024  }
 0x1bd   : > { %895 = vsyncadd (%p778_p8), %s633_s5, 4294966272  ;;  %p14_p9 = scmp.ge.s32.totalorder %s968_s21, 4   ;;  %s1172_s15 = smov %s902_s16 }
 0x1be   : > { %s1173_s16 = smov %s906_s17  ;;  %s1174_s17 = smov %s979_s24 }
 0x1bf   : > { %s1175_s18 = smov %s968_s21  ;;  %16 = sbr.rel (!%p14_p9) target bundleno = 3 (0x3), region = 71 }
 0x1c4   :  { %639 = vsyncpa [#allocation3], 1 }
 0x1c5   :  { %641 = vsyncpa [#allocation3 + $0x1], 1 }

</bundles_post_ra>
